<compile_context>
chip_gen: v7x
topology: tpu7x:2x2x1
jax: 0.10.0
libtpu: 0.0.40
codegen_flags: <defaults>
</compile_context>

<pallas_src>
import functools
import math
from collections import defaultdict

import jax
import jax.numpy as jnp
from jax.experimental import pallas as pl
from jax.experimental.pallas import tpu as pltpu


def _round_up(a, b):
    return (a + b - 1) // b * b


# ----------------------------------------------------------------------------
# Kernel 1: fused row-gather + per-edge-type message matmul + 1/degree scale.
# ----------------------------------------------------------------------------
def _msg_kernel(src_ref, type_ref, x_any, a_ref, norm_ref, out_ref, gbuf, sem,
                *, tile_m, s_max, d, o_pad):
    del type_ref  # consumed only by the A BlockSpec index_map
    nrows = tile_m * s_max
    base = pl.program_id(0) * nrows

    # Gather: gbuf row r holds x[src[tile, p, m]] with r = p * tile_m + m
    # (the wrapper stores the flattened source indices in that p-major order).
    @pl.loop(0, nrows)
    def _start(r):
        idx = src_ref[base + r]
        pltpu.make_async_copy(
            x_any.at[pl.ds(idx, 1), :],
            gbuf.at[pl.ds(r, 1), :],
            sem,
        ).start()

    # Wait for every row copy.  The wait descriptors reference gbuf row r so
    # the compiler cannot hoist the compute loads above the waits.
    @pl.loop(0, nrows)
    def _wait(r):
        pltpu.make_async_copy(
            x_any.at[pl.ds(0, 1), :],
            gbuf.at[pl.ds(r, 1), :],
            sem,
        ).wait()

    # msgs = norm * (concat_p x[src_p]) @ A  ==  norm * sum_p x[src_p] @ A_p
    acc = jnp.zeros((tile_m, o_pad), jnp.float32)
    for p in range(s_max):                                 # static, s_max small
        g_p = gbuf[pl.ds(p * tile_m, tile_m), :]           # (tile_m, d)
        a_p = a_ref[pl.ds(p * d, d), :]                    # (d, o_pad)
        acc = acc + jnp.dot(g_p, a_p, preferred_element_type=jnp.float32)
    out_ref[...] = norm_ref[...] * acc                     # lane-dense store


def _edge_messages(src_flat, tile_type, x_pad, a_stacked, norm, *,
                   tile_m, s_max, d, o_pad):
    num_tiles = int(tile_type.shape[0])
    m_pad = num_tiles * tile_m
    k_max = s_max * d
    e = int(a_stacked.shape[0])
    cost = pl.CostEstimate(
        flops=2 * m_pad * k_max * o_pad,
        transcendentals=0,
        bytes_accessed=4 * (m_pad * k_max + e * k_max * o_pad
                            + m_pad + 2 * m_pad * o_pad),
    )
    kernel = functools.partial(_msg_kernel, tile_m=tile_m, s_max=s_max,
                               d=d, o_pad=o_pad)
    return pl.pallas_call(
        kernel,
        out_shape=jax.ShapeDtypeStruct((m_pad, o_pad), jnp.float32),
        grid_spec=pltpu.PrefetchScalarGridSpec(
            num_scalar_prefetch=2,          # gather indices + per-tile edge type
            grid=(num_tiles,),
            in_specs=[
                pl.BlockSpec(memory_space=pl.ANY),            # x stays in HBM
                pl.BlockSpec((None, k_max, o_pad),             # A[type of tile]
                             lambda i, src, typ: (typ[i], 0, 0)),
                pl.BlockSpec((tile_m, 1),                      # 1/degree norm
                             lambda i, src, typ: (i, 0)),
            ],
            out_specs=pl.BlockSpec((tile_m, o_pad),
                                   lambda i, src, typ: (i, 0)),
            scratch_shapes=[
                pltpu.VMEM((tile_m * s_max, d), jnp.float32),  # gather buffer
                pltpu.SemaphoreType.DMA,
            ],
        ),
        compiler_params=pltpu.CompilerParams(
            dimension_semantics=("parallel",)),
        cost_estimate=cost,
    )(src_flat, tile_type, x_pad, a_stacked, norm)


# ----------------------------------------------------------------------------
# Kernel 2: row-tiled  h = x @ Wc + bc + agg  with resident Wc/bc and the agg
# buffer aliased to the output (in-place accumulate).
# ----------------------------------------------------------------------------
def _linear_kernel(x_ref, w_ref, b_ref, agg_ref, out_ref):
    out_ref[...] = (
        jnp.dot(x_ref[...], w_ref[...], preferred_element_type=jnp.float32)
        + b_ref[...]
        + agg_ref[...]
    )


def _linear_plus_agg(x_pad, w_pad, b_pad, agg, *, row_tile):
    n_pad, d = x_pad.shape
    o_pad = w_pad.shape[1]
    cost = pl.CostEstimate(
        flops=2 * n_pad * d * o_pad,
        transcendentals=0,
        bytes_accessed=4 * (n_pad * d + d * o_pad + o_pad + 2 * n_pad * o_pad),
    )
    return pl.pallas_call(
        _linear_kernel,
        out_shape=jax.ShapeDtypeStruct((n_pad, o_pad), jnp.float32),
        grid=(n_pad // row_tile,),
        in_specs=[
            pl.BlockSpec((row_tile, d), lambda i: (i, 0)),
            pl.BlockSpec((d, o_pad), lambda i: (0, 0)),    # Wc resident in VMEM
            pl.BlockSpec((1, o_pad), lambda i: (0, 0)),    # bc resident in VMEM
            pl.BlockSpec((row_tile, o_pad), lambda i: (i, 0)),
        ],
        out_specs=pl.BlockSpec((row_tile, o_pad), lambda i: (i, 0)),
        compiler_params=pltpu.CompilerParams(
            dimension_semantics=("parallel",)),            # 2 TCs on v7x
        cost_estimate=cost,
        input_output_aliases={3: 0},                       # reuse agg's buffer
    )(x_pad, w_pad, b_pad, agg)


# ----------------------------------------------------------------------------
# HGNNLayer forward (JAX glue + the two Pallas kernels above)
# ----------------------------------------------------------------------------
def make_hgnn_forward(input_dim, output_dim, shapes_dict, *, msg_tile=8,
                      row_tile_max=512):
    o_pad = _round_up(output_dim, 128)                 # lane-dense outputs
    msg_tile = max(8, _round_up(msg_tile, 8))
    row_tile_max = max(8, _round_up(row_tile_max, 8))

    def forward(x, indices_dict, params):
        n = x.shape[0]
        row_tile = min(row_tile_max, _round_up(n, 8))
        n_pad = _round_up(n, row_tile)
        x_pad = jnp.pad(x.astype(jnp.float32), ((0, n_pad - n), (0, 0)))

        w_pad = jnp.pad(params["Wc"], ((0, 0), (0, o_pad - output_dim)))
        b_pad = jnp.pad(params["bc"], ((0, 0), (0, o_pad - output_dim)))

        active = [e for e, idx in indices_dict.items()
                  if e in shapes_dict and idx.size > 0]

        if active:
            s_max = max(shapes_dict[e] for e in active)
            k_max = s_max * input_dim
            src_rows, dests, norms, a_list, tile_types = [], [], [], [], []
            for t, e in enumerate(active):
                s = shapes_dict[e]
                ei = indices_dict[e]
                m = ei.shape[1] // s
                src = ei[0].reshape(m, s).astype(jnp.int32)
                dest = ei[1].reshape(m, s)[:, 0].astype(jnp.int32)
                counts = jnp.zeros((n,), jnp.float32).at[dest].add(1.0)
                norm = 1.0 / counts[dest]                      # (m,)
                m_pad = _round_up(m, msg_tile)
                # pad hyperedges: src 0 / norm 0 / dest 0 -> exact-zero messages
                src = jnp.pad(src, ((0, m_pad - m), (0, s_max - s)))
                dest = jnp.pad(dest, (0, m_pad - m))
                norm = jnp.pad(norm, (0, m_pad - m))
                a = jnp.pad(params["A"][e],
                            ((0, k_max - s * input_dim),
                             (0, o_pad - output_dim)))
                src_rows.append(src)
                dests.append(dest)
                norms.append(norm)
                a_list.append(a)
                tile_types.append(jnp.full((m_pad // msg_tile,), t, jnp.int32))

            src_all = jnp.concatenate(src_rows, axis=0)        # (M_pad, s_max)
            dest_all = jnp.concatenate(dests, axis=0)          # (M_pad,)
            norm_all = jnp.concatenate(norms, axis=0)[:, None] # (M_pad, 1)
            a_stacked = jnp.stack(a_list, axis=0)              # (E, k_max, o_pad)
            tile_type = jnp.concatenate(tile_types, axis=0)    # (num_tiles,)
            num_tiles = tile_type.shape[0]

            # p-major gather-index layout per tile so the kernel's DMA
            # destination row is simply the flat loop index.
            src_flat = (src_all.reshape(num_tiles, msg_tile, s_max)
                        .transpose(0, 2, 1).reshape(-1))

            msgs = _edge_messages(src_flat, tile_type, x_pad, a_stacked,
                                  norm_all, tile_m=msg_tile, s_max=s_max,
                                  d=input_dim, o_pad=o_pad)   # (M_pad, o_pad)

            # TODO(synk): scatter-add with duplicate dest indices stays in JAX.
            agg = jnp.zeros((n_pad, o_pad), jnp.float32).at[dest_all].add(msgs)
        else:
            agg = jnp.zeros((n_pad, o_pad), jnp.float32)

        h_pad = _linear_plus_agg(x_pad, w_pad, b_pad, agg, row_tile=row_tile)
        return h_pad[:n, :output_dim]

    return jax.jit(forward)


# ----------------------------------------------------------------------------
# Parameter init mirroring the PyTorch module's shapes / init scheme.
# ----------------------------------------------------------------------------
def init_params(key, input_dim, output_dim, shapes_dict):
    shape_nums = defaultdict(int)
    for _, shape in shapes_dict.items():
        shape_nums[shape] += 1

    params = {"A": {}}
    keys = jax.random.split(key, 2 + len(shapes_dict))
    bound = 1.0 / math.sqrt(input_dim)
    params["Wc"] = jax.random.uniform(
        keys[0], (input_dim, output_dim), jnp.float32, -bound, bound)
    params["bc"] = jax.random.uniform(
        keys[1], (1, output_dim), jnp.float32, -bound, bound)
    for k, (edge, shape) in enumerate(sorted(shapes_dict.items())):
        std = math.sqrt(
            2.0 / (shape_nums[shape] * input_dim * shape
                   + shape_nums[shape] * output_dim))
        params["A"][edge] = std * jax.random.normal(
            keys[2 + k], (input_dim * shape, output_dim), jnp.float32)
    return params


# ----------------------------------------------------------------------------
# Pure-JAX reference (mirrors the PyTorch forward) for correctness checking.
# ----------------------------------------------------------------------------
def hgnn_layer_ref(x, indices_dict, params, shapes_dict, input_dim, output_dim):
    n = x.shape[0]
    agg = jnp.zeros((n, output_dim), dtype=jnp.float32)
    for edge, edge_indices in indices_dict.items():
        if edge not in shapes_dict or edge_indices.size == 0:
            continue
        s = shapes_dict[edge]
        i = jnp.reshape(edge_indices[1], (-1, s))[:, 0]
        tmp = x[edge_indices[0]].reshape(-1, input_dim * s)
        counts = jnp.zeros((n,), jnp.float32).at[i].add(1.0)
        norm = (1.0 / counts[i]).reshape(-1, 1)
        msgs = norm * (tmp @ params["A"][edge])
        agg = agg.at[i].add(msgs)
    return x @ params["Wc"] + params["bc"] + agg


# ----------------------------------------------------------------------------
if __name__ == "__main__":
    input_dim = 16
    output_dim = 32
    num_nodes = 12
    shapes_dict = {"rel2": 2, "rel3": 3}

    key = jax.random.PRNGKey(0)
    k_x, k_p, k_e2s, k_e2d, k_e3s, k_e3d = jax.random.split(key, 6)

    x = jax.random.normal(k_x, (num_nodes, input_dim), jnp.float32)
    params = init_params(k_p, input_dim, output_dim, shapes_dict)

    # rel2: 4 hyperedges of arity 2 -> edge_indices shape (2, 8)
    src2 = jax.random.randint(k_e2s, (8,), 0, num_nodes, jnp.int32)
    dst2 = jnp.repeat(jax.random.randint(k_e2d, (4,), 0, num_nodes, jnp.int32), 2)
    # rel3: 3 hyperedges of arity 3 -> edge_indices shape (2, 9)
    src3 = jax.random.randint(k_e3s, (9,), 0, num_nodes, jnp.int32)
    dst3 = jnp.repeat(jax.random.randint(k_e3d, (3,), 0, num_nodes, jnp.int32), 3)

    indices_dict = {
        "rel2": jnp.stack([src2, dst2], axis=0),
        "rel3": jnp.stack([src3, dst3], axis=0),
    }

    forward = make_hgnn_forward(input_dim, output_dim, shapes_dict)
    h = forward(x, indices_dict, params)
    h = jax.block_until_ready(h)

    h_ref = hgnn_layer_ref(x, indices_dict, params, shapes_dict,
                           input_dim, output_dim)
    assert h.shape == (num_nodes, output_dim)
    assert jnp.allclose(h, h_ref, atol=1e-4, rtol=1e-4)

    print("KERNEL_OK")
</pallas_src>

<mosaic_0001>
module attributes {stable_mosaic.version = 11 : i64} {
  func.func @_linear_kernel(%arg0: i32, %arg1: memref<16x16xf32, #tpu.memory_space<vmem>>, %arg2: memref<16x128xf32, #tpu.memory_space<vmem>>, %arg3: memref<1x128xf32, #tpu.memory_space<vmem>>, %arg4: memref<16x128xf32, #tpu.memory_space<vmem>>, %arg5: memref<16x128xf32, #tpu.memory_space<vmem>>) attributes {dimension_semantics = [#tpu.dimension_semantics<parallel>], iteration_bounds = array<i64: 1>, scalar_prefetch = 0 : i64, scratch_operands = 0 : i64, tpu.core_type = #tpu.core_type<tc>, window_params = [{transform_indices = @transform_0, window_bounds = array<i64: 16, 16>}, {pipeline_mode = #tpu.pipeline_mode<synchronous>, transform_indices = @transform_1, window_bounds = array<i64: 16, 128>}, {pipeline_mode = #tpu.pipeline_mode<synchronous>, transform_indices = @transform_2, window_bounds = array<i64: 1, 128>}, {transform_indices = @transform_3, window_bounds = array<i64: 16, 128>}, {transform_indices = @transform_4, window_bounds = array<i64: 16, 128>}]} {
    %c0 = arith.constant 0 : index
    %c0_0 = arith.constant 0 : index
    %0 = vector.load %arg1[%c0, %c0_0] : memref<16x16xf32, #tpu.memory_space<vmem>>, vector<16x16xf32>
    %c0_1 = arith.constant 0 : index
    %c0_2 = arith.constant 0 : index
    %1 = vector.load %arg2[%c0_1, %c0_2] : memref<16x128xf32, #tpu.memory_space<vmem>>, vector<16x128xf32>
    %cst = arith.constant dense<0.000000e+00> : vector<16x128xf32>
    %2 = tpu.matmul %0, %1, %cst {dimension_numbers = #tpu.dot_dimension_numbers<[1], [0], [0], [1], [0, 0, 1, 1], [], []>} : vector<16x16xf32>, vector<16x128xf32>, vector<16x128xf32> -> vector<16x128xf32>
    %c0_3 = arith.constant 0 : index
    %c0_4 = arith.constant 0 : index
    %3 = vector.load %arg3[%c0_3, %c0_4] : memref<1x128xf32, #tpu.memory_space<vmem>>, vector<1x128xf32>
    %4 = vector.broadcast %3 : vector<1x128xf32> to vector<16x128xf32>
    %5 = arith.addf %2, %4 : vector<16x128xf32>
    %c0_5 = arith.constant 0 : index
    %c0_6 = arith.constant 0 : index
    %6 = vector.load %arg4[%c0_5, %c0_6] : memref<16x128xf32, #tpu.memory_space<vmem>>, vector<16x128xf32>
    %7 = arith.addf %5, %6 : vector<16x128xf32>
    %c0_7 = arith.constant 0 : index
    %c0_8 = arith.constant 0 : index
    %8 = vector.load %arg5[%c0_7, %c0_8] : memref<16x128xf32, #tpu.memory_space<vmem>>, vector<16x128xf32>
    tpu.vector_store %arg5[%c0_7, %c0_8], %7 {strides = array<i32>} : memref<16x128xf32, #tpu.memory_space<vmem>>, vector<16x128xf32>,
    return
  }
  func.func @transform_0(%arg0: i32) -> (i32, i32) {
    %c0_i32 = arith.constant 0 : i32
    %c0_i32_0 = arith.constant 0 : i32
    return %arg0, %c0_i32 : i32, i32
  }
  func.func @transform_1(%arg0: i32) -> (i32, i32) {
    %c0_i32 = arith.constant 0 : i32
    %c0_i32_0 = arith.constant 0 : i32
    %c0_i32_1 = arith.constant 0 : i32
    return %c0_i32, %c0_i32_0 : i32, i32
  }
  func.func @transform_2(%arg0: i32) -> (i32, i32) {
    %c0_i32 = arith.constant 0 : i32
    %c0_i32_0 = arith.constant 0 : i32
    %c0_i32_1 = arith.constant 0 : i32
    return %c0_i32, %c0_i32_0 : i32, i32
  }
  func.func @transform_3(%arg0: i32) -> (i32, i32) {
    %c0_i32 = arith.constant 0 : i32
    %c0_i32_0 = arith.constant 0 : i32
    return %arg0, %c0_i32 : i32, i32
  }
  func.func @transform_4(%arg0: i32) -> (i32, i32) {
    %c0_i32 = arith.constant 0 : i32
    %c0_i32_0 = arith.constant 0 : i32
    return %arg0, %c0_i32 : i32, i32
  }
}

module attributes {stable_mosaic.version = 11 : i64} {
  func.func @_msg_kernel(%arg0: i32, %arg1: memref<48xi32, #tpu.memory_space<smem>>, %arg2: memref<2xi32, #tpu.memory_space<smem>>, %arg3: memref<16x16xf32, #tpu.memory_space<any>>, %arg4: memref<1x48x128xf32, #tpu.memory_space<vmem>>, %arg5: memref<8x1xf32, #tpu.memory_space<vmem>>, %arg6: memref<8x128xf32, #tpu.memory_space<vmem>>, %arg7: memref<24x16xf32, #tpu.memory_space<vmem>>, %arg8: memref<!tpu.dma_semaphore, #tpu.memory_space<semaphore_mem>>) attributes {dimension_semantics = [#tpu.dimension_semantics<parallel>], iteration_bounds = array<i64: 2>, scalar_prefetch = 2 : i64, scratch_operands = 2 : i64, tpu.core_type = #tpu.core_type<tc>, window_params = [{}, {transform_indices = @transform_1, window_bounds = array<i64: 1, 48, 128>}, {transform_indices = @transform_2, window_bounds = array<i64: 8, 1>}, {transform_indices = @transform_3, window_bounds = array<i64: 8, 128>}]} {
    %c24_i32 = arith.constant 24 : i32
    %0 = arith.muli %arg0, %c24_i32 : i32
    %c0_i32 = arith.constant 0 : i32
    %c24_i32_0 = arith.constant 24 : i32
    %1 = arith.addi %c0_i32, %c24_i32_0 : i32
    %c1_i32 = arith.constant 1 : i32
    scf.for %arg9 = %c0_i32 to %1 step %c1_i32  : i32 {
      %c1_i32_24 = arith.constant 1 : i32
      %23 = arith.muli %arg9, %c1_i32_24 : i32
      %c0_i32_25 = arith.constant 0 : i32
      %24 = arith.addi %c0_i32_25, %23 : i32
      %25 = arith.addi %0, %24 : i32
      %26 = arith.index_cast %25 : i32 to index
      %27 = memref.load %arg1[%26] : memref<48xi32, #tpu.memory_space<smem>>
      %c0_i32_26 = arith.constant 0 : i32
      %28 = tpu.memref_slice %arg3[%27, %c0_i32_26] : memref<16x16xf32, #tpu.memory_space<any>> -> memref<1x16xf32, #tpu.memory_space<any>>
      %c0_i32_27 = arith.constant 0 : i32
      %29 = tpu.memref_slice %arg7[%24, %c0_i32_27] : memref<24x16xf32, #tpu.memory_space<vmem>> -> memref<1x16xf32, #tpu.memory_space<vmem>>
      tpu.enqueue_dma source(%28 : memref<1x16xf32, #tpu.memory_space<any>>) target(%29 : memref<1x16xf32, #tpu.memory_space<vmem>>) target_semaphore(%arg8 : memref<!tpu.dma_semaphore, #tpu.memory_space<semaphore_mem>>)
    }
    %c24_i32_1 = arith.constant 24 : i32
    %c0_i32_2 = arith.constant 0 : i32
    %c24_i32_3 = arith.constant 24 : i32
    %2 = arith.addi %c0_i32_2, %c24_i32_3 : i32
    %c1_i32_4 = arith.constant 1 : i32
    scf.for %arg9 = %c0_i32_2 to %2 step %c1_i32_4  : i32 {
      %c1_i32_24 = arith.constant 1 : i32
      %23 = arith.muli %arg9, %c1_i32_24 : i32
      %c0_i32_25 = arith.constant 0 : i32
      %24 = arith.addi %c0_i32_25, %23 : i32
      %c0_i32_26 = arith.constant 0 : i32
      %c0_i32_27 = arith.constant 0 : i32
      %25 = tpu.memref_slice %arg3[%c0_i32_26, %c0_i32_27] : memref<16x16xf32, #tpu.memory_space<any>> -> memref<1x16xf32, #tpu.memory_space<any>>
      %c0_i32_28 = arith.constant 0 : i32
      %26 = tpu.memref_slice %arg7[%24, %c0_i32_28] : memref<24x16xf32, #tpu.memory_space<vmem>> -> memref<1x16xf32, #tpu.memory_space<vmem>>
      tpu.wait_dma2 semaphore(%arg8 : memref<!tpu.dma_semaphore, #tpu.memory_space<semaphore_mem>>) src(%25 : memref<1x16xf32, #tpu.memory_space<any>>) dst(%26 : memref<1x16xf32, #tpu.memory_space<vmem>>)
    }
    %c24_i32_5 = arith.constant 24 : i32
    %cst = arith.constant 0.000000e+00 : f32
    %3 = vector.broadcast %cst : f32 to vector<8x128xf32>
    %c0 = arith.constant 0 : index
    %c0_6 = arith.constant 0 : index
    %4 = vector.load %arg7[%c0, %c0_6] : memref<24x16xf32, #tpu.memory_space<vmem>>, vector<8x16xf32>
    %c0_7 = arith.constant 0 : index
    %c0_8 = arith.constant 0 : index
    %c0_9 = arith.constant 0 : index
    %5 = vector.load %arg4[%c0_7, %c0_8, %c0_9] : memref<1x48x128xf32, #tpu.memory_space<vmem>>, vector<1x16x128xf32>
    %6 = vector.shape_cast %5 : vector<1x16x128xf32> to vector<16x128xf32>
    %cst_10 = arith.constant dense<0.000000e+00> : vector<8x128xf32>
    %7 = tpu.matmul %4, %6, %cst_10 {dimension_numbers = #tpu.dot_dimension_numbers<[1], [0], [0], [1], [0, 0, 1, 1], [], []>} : vector<8x16xf32>, vector<16x128xf32>, vector<8x128xf32> -> vector<8x128xf32>
    %8 = arith.addf %3, %7 : vector<8x128xf32>
    %c8 = arith.constant 8 : index
    %c0_11 = arith.constant 0 : index
    %9 = vector.load %arg7[%c8, %c0_11] : memref<24x16xf32, #tpu.memory_space<vmem>>, vector<8x16xf32>
    %c0_12 = arith.constant 0 : index
    %c16 = arith.constant 16 : index
    %c0_13 = arith.constant 0 : index
    %10 = vector.load %arg4[%c0_12, %c16, %c0_13] : memref<1x48x128xf32, #tpu.memory_space<vmem>>, vector<1x16x128xf32>
    %11 = vector.shape_cast %10 : vector<1x16x128xf32> to vector<16x128xf32>
    %cst_14 = arith.constant dense<0.000000e+00> : vector<8x128xf32>
    %12 = tpu.matmul %9, %11, %cst_14 {dimension_numbers = #tpu.dot_dimension_numbers<[1], [0], [0], [1], [0, 0, 1, 1], [], []>} : vector<8x16xf32>, vector<16x128xf32>, vector<8x128xf32> -> vector<8x128xf32>
    %13 = arith.addf %8, %12 : vector<8x128xf32>
    %c16_15 = arith.constant 16 : index
    %c0_16 = arith.constant 0 : index
    %14 = vector.load %arg7[%c16_15, %c0_16] : memref<24x16xf32, #tpu.memory_space<vmem>>, vector<8x16xf32>
    %c0_17 = arith.constant 0 : index
    %c32 = arith.constant 32 : index
    %c0_18 = arith.constant 0 : index
    %15 = vector.load %arg4[%c0_17, %c32, %c0_18] : memref<1x48x128xf32, #tpu.memory_space<vmem>>, vector<1x16x128xf32>
    %16 = vector.shape_cast %15 : vector<1x16x128xf32> to vector<16x128xf32>
    %cst_19 = arith.constant dense<0.000000e+00> : vector<8x128xf32>
    %17 = tpu.matmul %14, %16, %cst_19 {dimension_numbers = #tpu.dot_dimension_numbers<[1], [0], [0], [1], [0, 0, 1, 1], [], []>} : vector<8x16xf32>, vector<16x128xf32>, vector<8x128xf32> -> vector<8x128xf32>
    %18 = arith.addf %13, %17 : vector<8x128xf32>
    %c0_20 = arith.constant 0 : index
    %c0_21 = arith.constant 0 : index
    %19 = vector.load %arg5[%c0_20, %c0_21] : memref<8x1xf32, #tpu.memory_space<vmem>>, vector<8x1xf32>
    %20 = vector.broadcast %19 : vector<8x1xf32> to vector<8x128xf32>
    %21 = arith.mulf %20, %18 : vector<8x128xf32>
    %c0_22 = arith.constant 0 : index
    %c0_23 = arith.constant 0 : index
    %22 = vector.load %arg6[%c0_22, %c0_23] : memref<8x128xf32, #tpu.memory_space<vmem>>, vector<8x128xf32>
    tpu.vector_store %arg6[%c0_22, %c0_23], %21 {strides = array<i32>} : memref<8x128xf32, #tpu.memory_space<vmem>>, vector<8x128xf32>,
    return
  }
  func.func @transform_1(%arg0: i32, %arg1: memref<48xi32, #tpu.memory_space<smem>>, %arg2: memref<2xi32, #tpu.memory_space<smem>>) -> (i32, i32, i32) {
    %0 = arith.index_cast %arg0 : i32 to index
    %1 = memref.load %arg2[%0] : memref<2xi32, #tpu.memory_space<smem>>
    %c0_i32 = arith.constant 0 : i32
    %c0_i32_0 = arith.constant 0 : i32
    %c0_i32_1 = arith.constant 0 : i32
    return %1, %c0_i32, %c0_i32_0 : i32, i32, i32
  }
  func.func @transform_2(%arg0: i32, %arg1: memref<48xi32, #tpu.memory_space<smem>>, %arg2: memref<2xi32, #tpu.memory_space<smem>>) -> (i32, i32) {
    %c0_i32 = arith.constant 0 : i32
    %c0_i32_0 = arith.constant 0 : i32
    return %arg0, %c0_i32 : i32, i32
  }
  func.func @transform_3(%arg0: i32, %arg1: memref<48xi32, #tpu.memory_space<smem>>, %arg2: memref<2xi32, #tpu.memory_space<smem>>) -> (i32, i32) {
    %c0_i32 = arith.constant 0 : i32
    %c0_i32_0 = arith.constant 0 : i32
    return %arg0, %c0_i32 : i32, i32
  }
}

</mosaic_0001>

<bundles_post_ra>
// kernel: squeeze.7
= control target key start
LH: loop header
LB: loop body
LE: loop exit
PB: predicated region body
PF: predicated region fallthrough
CT: control target
= control target key end

     0   :  { %s37_s8 = smov 122   ;;  %vm7_vm0 = vcmask 15360   ;;  %s38_s9 = smov 124   ;;  %s55_s0 = inlined_call_operand.vmem [shape: s32[8], index: 0, kind: input, shape index: {}]   ;;  %s56_s1 = inlined_call_operand.vmem [shape: s32[4,2], index: 1, kind: output, shape index: {}]  }
   0x1   :  { %v4_v0 = vld [vmem:[%s55_s0] sm:$0x1]  ;;  %s36_s0 = smov 126  }
   0x2   :  { %5 = vst [vmem:[#allocation1] sm:$0x1] %v4_v0 }
   0x9   :  { %v9_v1 = vld [vmem:[#allocation1] sm:$0x1]  }
   0xa   :  { %v21_v2 = vld [vmem:[#allocation1] sm:$0x1]   ;;  %10 = vrot.lane.b32.xlu0 %v9_v1, %s36_s0 }
   0xb   :  { %22 = vrot.lane.b32.xlu1 %v21_v2, %s37_s8  ;;  %v6_v3 = vld [vmem:[#allocation1] sm:$0x1]  }
   0xc   :  { %v15_v4 = vld [vmem:[#allocation1] sm:$0x1]   ;;  %8 = vst.msk [vmem:[#allocation0] sm:$0x1] %vm7_vm0, %v6_v3  }
   0xe   :  { %16 = vrot.lane.b32.xlu0 %v15_v4, %s38_s9 }
  0x7c   :  { %v11_v5 = vpop.permute.xlu0 %10  }
  0x7d   :  { %v23_v6 = vpop.permute.xlu1 %22   ;;  %14 = vst.msk [vmem:[#allocation0 + $0x1] sm:$0x1] %vm7_vm0, %v11_v5  }
  0x7e   :  { %26 = vst.msk [vmem:[#allocation0 + $0x3] sm:$0x1] %vm7_vm0, %v23_v6  }
  0x80   :  { %v17_v7 = vpop.permute.xlu0 %16  }
  0x81   :  { %20 = vst.msk [vmem:[#allocation0 + $0x2] sm:$0x1] %vm7_vm0, %v17_v7  }
  0x88   :  { %v30_v8 = vld [vmem:[#allocation0] sm:$0xf] }
  0x89   :  { %32 = vst [vmem:[%s56_s1] sm:$0xf] %v30_v8 }

// kernel: squeeze.10
= control target key start
LH: loop header
LB: loop body
LE: loop exit
PB: predicated region body
PF: predicated region fallthrough
CT: control target
= control target key end

     0   :  { %vm7_vm0 = vcmask 23552   ;;  %s30_s8 = smov 122   ;;  %s47_s0 = inlined_call_operand.vmem [shape: s32[9], index: 0, kind: input, shape index: {}]   ;;  %s48_s1 = inlined_call_operand.vmem [shape: s32[3,3], index: 1, kind: output, shape index: {}]  }
   0x1   :  { %v4_v0 = vld [vmem:[%s47_s0] sm:$0x1]  ;;  %s29_s0 = smov 125  }
   0x2   :  { %5 = vst [vmem:[#allocation1] sm:$0x1] %v4_v0 }
   0x9   :  { %v9_v1 = vld [vmem:[#allocation1] sm:$0x1]  }
   0xa   :  { %v6_v2 = vld [vmem:[#allocation1] sm:$0x1]   ;;  %10 = vrot.lane.b32.xlu0 %v9_v1, %s29_s0 }
   0xb   :  { %8 = vst.msk [vmem:[#allocation0] sm:$0x1] %vm7_vm0, %v6_v2   ;;  %v15_v3 = vld [vmem:[#allocation1] sm:$0x1]  }
   0xe   :  { %16 = vrot.lane.b32.xlu0 %v15_v3, %s30_s8 }
  0x7c   :  { %v11_v4 = vpop.permute.xlu0 %10  }
  0x7d   :  { %14 = vst.msk [vmem:[#allocation0 + $0x1] sm:$0x1] %vm7_vm0, %v11_v4  }
  0x80   :  { %v17_v5 = vpop.permute.xlu0 %16  }
  0x81   :  { %20 = vst.msk [vmem:[#allocation0 + $0x2] sm:$0x1] %vm7_vm0, %v17_v5  }
  0x88   :  { %v24_v6 = vld [vmem:[#allocation0] sm:$0xf] }
  0x89   :  { %26 = vst [vmem:[%s48_s1] sm:$0xf] %v24_v6 }

// kernel: forward.3
= control target key start
LH: loop header
LB: loop body
LE: loop exit
PB: predicated region body
PF: predicated region fallthrough
CT: control target
= control target key end

     0   :  { %vm28_vm0 = vcmask 130048   ;;  %s190_s1 = inlined_call_operand.vmem [shape: f32[16,128], index: 1, kind: input, shape index: {}]   ;;  %s191_s0 = inlined_call_operand.vmem [shape: f32[16,16], index: 0, kind: input, shape index: {}]   ;;  %s192_s2 = inlined_call_operand.vmem [shape: f32[1,128], index: 2, kind: input, shape index: {}]   ;;  %s193_s3 = inlined_call_operand.vmem [shape: f32[16,128], index: 3, kind: input, shape index: {}, may-alias: {3,4}]   ;;  %s194_s4 = inlined_call_operand.vmem [shape: f32[16,128], index: 4, kind: output, shape index: {}, may-alias: {3,4}]  }
   0x1   :  { %v19_v0 = vld [vmem:[%s190_s1] sm:$0xff]  ;;  %v20_v1 = vld [vmem:[%s190_s1 + $0x8] sm:$0xff] }
   0x2   :  { %v17_v2 = vld [vmem:[%s191_s0] sm:$0xff]  ;;  %v134_v3 = vpack.c.bf16 %v20_v1, %v19_v0  ;;  %v18_v4 = vld [vmem:[%s191_s0 + $0x8] sm:$0xff] }
   0x3   :  { %131 = vmatprep.mubr.msk.f32.mxu0 %vm28_vm0, %v17_v2  ;;  %v120_v5 = vld [vmem:[%s192_s2] ss:$0 sm:$0xff]  ;;  %v111_v7 = vld [vmem:[%s193_s3 + $0x8] sm:$0xff] }
   0x4   :  { %135 = vmatprep.subr.bf16.mxu0 %v134_v3  ;;  %v110_v10 = vld [vmem:[%s193_s3] sm:$0xff] }
   0x5   :  { %137 = vmatpush3.bf16.msra.mxu0 %v134_v3 }
   0x8   :  { %132 = vmatmul.mubr.msk.f32.vlgmr.msra.gmra.mrb[0].mxu0 %vm28_vm0, %v18_v4 }
  0xdb   :  { %v133_v6 = vpop.f32.mrb[0].mxu0 }
  0xdc   :  { %v107_v8 = vadd.f32 %v133_v6, %v120_v5  ;;  %v101_v9 = vpop.f32.mrb[1].mxu0 }
  0xdd   :  { %v102_v11 = vadd.f32 %v120_v5, %v101_v9 }
  0xde   :  { %v113_v12 = vadd.f32 %v111_v7, %v107_v8 }
  0xdf   :  { %v112_v13 = vadd.f32 %v110_v10, %v102_v11 }
  0xe0   :  { %115 = vst [vmem:[%s194_s4 + $0x8] sm:$0xff] %v113_v12 }
  0xe1   :  { %114 = vst [vmem:[%s194_s4] sm:$0xff] %v112_v13 }

// kernel: forward.2
= control target key start
LH: loop header
LB: loop body
LE: loop exit
PB: predicated region body
PF: predicated region fallthrough
CT: control target
= control target key end

     0   :  { %s802_s0 = inlined_call_operand.vmem [shape: s32[48], index: 0, kind: input, shape index: {}]   ;;  %s803_s2 = inlined_call_operand.vmem [shape: f32[16,16], index: 2, kind: input, shape index: {}]   ;;  %s804_s3 = inlined_call_operand.vmem [shape: f32[2,48,128], index: 3, kind: input, shape index: {}]   ;;  %s805_s4 = inlined_call_operand.vmem [shape: f32[16,1], index: 4, kind: input, shape index: {}]   ;;  %s806_s5 = inlined_call_operand.vmem [shape: f32[16,128], index: 5, kind: output, shape index: {}]   ;;  %s807_s1 = inlined_call_operand.vmem [shape: s32[2], index: 1, kind: input, shape index: {}]  }
   0x1   :  { %s10_s20 = sshll.u32 %s802_s0, 4  ;;  %s14_s23 = sshll.u32 %s807_s1, 4  ;;  %s11_s20 = int_to_ptr.vmem [resolvable:$true] %s10_s20  ;;  %s15_s23 = int_to_ptr.vmem [resolvable:$true] %s14_s23 }
   0x2   :  { %s662_s24 = scalar_lea.vmem %s11_s20, 16  ;;  %p667_p1 = scmp.lt.s32.totalorder %s11_s20, %s11_s20 }
   0x3   :  { %p663_p0 = scmp.ne.s32.totalorder %s11_s20, %s662_s24  ;;  %p668_p2 = scmp.lt.s32.totalorder %s662_s24, %s662_s24 }
   0x5   :  { %p669_p3 = por %p668_p2, %p667_p1 }
   0x7   :  { %p670_p4 = pnand %p669_p3, %p663_p0 }
   0x9   :  { %673 = shalt.err (!%p670_p4)  }
   0xa   :  { %s714_s25 = smov [#allocation5]   ;;  %s674_s26 = scalar_lea.vmem %s15_s23, 16 }
   0xb   :  { %13 = dma.vmem_to_smem %s11_s20, 16, %s714_s25, [#allocation4] }
   0xc   :  { %p675_p5 = scmp.ne.s32.totalorder %s15_s23, %s674_s26  ;;  %p679_p6 = scmp.lt.s32.totalorder %s15_s23, %s15_s23 }
   0xd   :  { %p680_p7 = scmp.lt.s32.totalorder %s674_s26, %s674_s26 }
   0xf   :  { %p681_p8 = por %p680_p7, %p679_p6 }
  0x11   :  { %p682_p9 = pnand %p681_p8, %p675_p5 }
  0x13   :  { %685 = shalt.err (!%p682_p9)  }
  0x14   :  { %s715_s0 = smov [#allocation6]  }
  0x15   :  { %17 = dma.vmem_to_smem %s15_s23, 16, %s715_s0, [#allocation4] }
  0x16   :  { %698 = dma.done.wait [#allocation4], 32 }
  0x17   :  { %699 = vsyncadd [#allocation4], 4294967264 }
  0x18   :  { %19 = sfence }
  0x19   :  { %s756_s1 = smov 0  }
  0x1a LB: > { %s762_s27 = sadd.s32 4294967295, %s704_s1   ;;  %p578_p10 = scmp.ge.s32.totalorder %s704_s1, 1  ;;  %s704_s1 = sphi %s756_s1, %s25_s1  }
  0x1b   : > { %p138_p11 = scmp.lt.s32.totalorder %s704_s1, 3 }
  0x1d   : > { %p139_p12 = pnand %p578_p10, %p138_p11 }
  0x1e   : > { %s164_s28 = sld [smem:[#allocation6 + %s762_s27]] (!%p139_p12)  ;;  %p171_p13 = scmp.lt.s32.totalorder (!%p139_p12), %s762_s27, 1 }
  0x1f   : > { %142 = sbr.rel (%p139_p12) target bundleno = 296 (0x128), region = 28  ;;  %s706_s16 = smov (!%p139_p12), 0  }
  0x20   : > { %s179_s29 = smul.u32 (!%p139_p12), 24, %s762_s27 }
  0x24   : > { %p165_p0 = scmp.lt.s32.totalorder (!%p139_p12), %s164_s28, 1 }
  0x26   : > { %s809_s27 = smov (!%p171_p13, %s762_s27), 1  ;;  %s811_s28 = smov (!%p165_p0, %s164_s28), 1 }
  0x27   : > { %s580_s30 = sshll.u32 %s809_s27, 3  ;;  %s630_s12 = smul.u32 48, %s811_s28 }
  0x28   : > { %s773_s8 = scalar_lea.vmem %s805_s4, %s580_s30  ;;  %s778_s11 = scalar_lea.vmem %s806_s5, %s580_s30 }
  0x29   : > { %s783_s15 = scalar_lea.vmem %s804_s3, %s630_s12 }
  0x2a LB: >> { %s186_s17 = sadd.s32 %s708_s16, %s179_s29  ;;  %s189_s22 = scalar_lea.vmem [#allocation2], %s708_s16  ;;  %s708_s16 = sphi %s706_s16, %s185_s16  }
  0x2b   : >> { %s187_s18 = sld [smem:[#allocation5 + %s186_s17]] }
  0x31   : >> { %s188_s21 = scalar_lea.vmem %s803_s2, %s187_s18 }
  0x32   : >> { %v207_v0 = vld [vmem:[%s188_s21] sm:$0x1] }
  0x33   : >> { %208 = vst [vmem:[%s189_s22] sm:$0x1] %v207_v0 }
  0x34   : >> { %233 = vsyncadd [#allocation3], 16  ;;  %s185_s16 = sadd.s32 1, %s708_s16  }
  0x35   : >> { %p182_p1 = scmp.ge.s32.totalorder %s185_s16, 24  }
  0x36   : > { %s710_s23 = smov (%p182_p1), 0  }
  0x37   : > { %184 = sbr.rel (!%p182_p1) target bundleno = 42 (0x2a), region = 117 }
  0x3e LB: >> { %700 = dma.done.wait [#allocation3], 16  ;;  %s712_s23 = sphi %s710_s23, %s239_s23  }
  0x3f   : >> { %701 = vsyncadd [#allocation3], 4294967280  ;;  %s239_s23 = sadd.s32 1, %s712_s23  }
  0x40   : >> { %p236_p2 = scmp.ge.s32.totalorder %s239_s23, 24  }
  0x41   : > { %v244_v1 = vld [vmem:[%s783_s15] sm:$0xff] (%p236_p2)  ;;  %v245_v2 = vld [vmem:[%s783_s15 + $0x8] sm:$0xff] (%p236_p2)  ;;  %v716_v3 = vmov (%p236_p2), 0.0|0.0   ;;  %vm717_vm0 = vmmov (%p236_p2), 0   ;;  %v718_v5 = vmov (%p236_p2), 0.0   ;;  %v247_v8 = vld [vmem:[%s783_s15 + $0x10] sm:$0xff] (%p236_p2) }
  0x42   : > { %238 = sbr.rel (!%p236_p2) target bundleno = 62 (0x3e), region = 128  ;;  %621 = vmatprep.subr.bf16.mxu0 (%p236_p2), %v716_v3  ;;  %v622_v4 = vpack.c.bf16 (%p236_p2), %v245_v2, %v244_v1  ;;  %608 = vmatprep.mubr.msk.f32.mxu0 (%p236_p2), %vm717_vm0, %v718_v5  ;;  %v397_v6 = vld [vmem:[%s783_s15 + $0x20] sm:$0xff] (%p236_p2)  ;;  %v398_v7 = vld [vmem:[%s783_s15 + $0x28] sm:$0xff] (%p236_p2)  ;;  %v248_v9 = vld [vmem:[%s783_s15 + $0x18] sm:$0xff] (%p236_p2)  ;;  %vm249_vm1 = vcmask (%p236_p2), 130048   ;;  %v719_v13 = vmov (%p236_p2), 0  }
  0x43   : > { %618 = vmatprep.subr.bf16.mxu1 (%p236_p2), %v716_v3  ;;  %601 = vmatprep.mubr.msk.f32.mxu1 (%p236_p2), %vm717_vm0, %v718_v5  ;;  %v243_v10 = vld [vmem:[#allocation2] sm:$0xff] (%p236_p2)  ;;  %v625_v11 = vpack.c.bf16 (%p236_p2), %v398_v7, %v397_v6  ;;  %v619_v12 = vpack.c.bf16 (%p236_p2), %v248_v9, %v247_v8  ;;  %v246_v15 = vld [vmem:[#allocation2 + $0x8] sm:$0xff] (%p236_p2)  ;;  %v396_v16 = vld [vmem:[#allocation2 + $0x10] sm:$0xff] (%p236_p2) }
  0x44   : > { %623 = vmatpush3.bf16.msra.mxu0 (%p236_p2), %v622_v4  ;;  %661 = vset.pattern.permute.xlu0 (%p236_p2), %v719_v13  ;;  %v473_v14 = vld [vmem:[%s773_s8] sm:$0xff] (%p236_p2) }
  0x45   : > { %624 = vmatprep.subr.bf16.mxu0 (%p236_p2), %v716_v3  ;;  %476 = vperm.xlu0 (%p236_p2), %661, %v473_v14  }
  0x46   : > { %620 = vmatpush3.bf16.msra.mxu1 (%p236_p2), %v619_v12 }
  0x47   : > { %609 = vmatmul.mubr.msk.f32.vlgmr.msra.gmra.mrb[0].mxu0 (%p236_p2), %vm249_vm1, %v243_v10 }
  0x48   : > { %626 = vmatpush3.bf16.msra.mxu0 (%p236_p2), %v625_v11  ;;  %615 = vmatprep.mubr.msk.f32.mxu0 (%p236_p2), %vm717_vm0, %v718_v5 }
  0x49   : > { %602 = vmatmul.mubr.msk.f32.vlgmr.msra.gmra.mrb[0].mxu1 %vm249_vm1, %v246_v15 }
  0x4f   : > { %616 = vmatmul.mubr.msk.f32.vlgmr.msra.gmra.mrb[0].mxu0 %vm249_vm1, %v396_v16 }
  0xc4   : > { %v477_v20 = vpop.permute.xlu0 %476 }
 0x11c   : > { %v319_v17 = vpop.f32.mrb[0].mxu1 }
 0x11d   : > { %v603_v18 = vpop.f32.mrb[1].mxu1 }
 0x122   : > { %v468_v19 = vpop.f32.mrb[0].mxu0 }
 0x123   : > { %v627_v21 = vadd.f32 %v468_v19, %v319_v17  ;;  %v617_v22 = vpop.f32.mrb[1].mxu0 }
 0x125   : > { %v479_v23 = vmul.f32 %v627_v21, %v477_v20 }
 0x127   : > { %480 = vst [vmem:[%s778_s11] sm:$0xff] %v479_v23 }
 0x128 PF: > { %s25_s1 = sadd.s32 1, %s704_s1  }
 0x129   : > { %p22_p3 = scmp.ge.s32.totalorder %s25_s1, 4  }
 0x12b   :  { %24 = sbr.rel (!%p22_p3) target bundleno = 26 (0x1a), region = 139 }
 0x132   :  { %500 = vsyncmov [#allocation3] }
 0x135   :  { %s501_s24 = vpop.sfrf %500 }
 0x136   :  { %p587_p4 = scmp.ne.s32.totalorder %s501_s24, 0 }
 0x138   :  { %505 = shalt.err (%p587_p4)  }

</bundles_post_ra>
